<compile_context>
chip_gen: v7x
topology: tpu7x:2x2x1
jax: 0.10.0
libtpu: 0.0.40
codegen_flags: <defaults>
</compile_context>

<pallas_src>
import functools
import math

import jax
import jax.numpy as jnp
from jax.experimental import pallas as pl
from jax.experimental.pallas import tpu as pltpu


def _round_up(x, m):
    return ((x + m - 1) // m) * m


def _cdiv(a, b):
    return (a + b - 1) // b


def _lcm(a, b):
    return a * b // math.gcd(a, b)


def _block_diag(blocks):
    """(B, K, D) -> (B*K, B*D) block-diagonal matrix."""
    B, K, D = blocks.shape
    eye = jnp.eye(B, dtype=blocks.dtype)
    return jnp.einsum("bkd,bc->bkcd", blocks, eye).reshape(B * K, B * D)


# --------------------------------------------------------------------------- #
# Kernel
# --------------------------------------------------------------------------- #
def _plr_kernel(x_ref, rfreq_ref, w_ref, bias_ref, o_ref):
    # Per grid step (j = feature block, i = batch tile):
    #   x_ref    : (1, TN, FB)        batch tile of the FB features in this block
    #   rfreq_ref: (1, FB, FB*F)      2*pi*frequencies folded into a block
    #                                 "repeat" matrix (rfreq[f, f*F+k] = 2*pi*w_fk)
    #   w_ref    : (1, 2*FB*F, FB*D)  fused block-diagonal [cos; sin] weights
    #   bias_ref : (1, 1, FB*D)
    #   o_ref    : (TN, FB*D)         lane-dense output tile
    x = x_ref[0].astype(jnp.float32)                                  # (TN, FB)
    # phase[n, f*F + k] = 2*pi * freq[f, k] * x[n, f]  (single f32 MXU matmul)
    phase = jnp.dot(x, rfreq_ref[0], preferred_element_type=jnp.float32)
    feats = jnp.concatenate([jnp.cos(phase), jnp.sin(phase)], axis=-1)
    acc = jnp.dot(feats.astype(w_ref.dtype), w_ref[0],
                  preferred_element_type=jnp.float32)                 # (TN, FB*D)
    acc = acc + bias_ref[0]
    o_ref[...] = jnp.maximum(acc, 0.0).astype(o_ref.dtype)


# --------------------------------------------------------------------------- #
# Parameter preprocessing (do once, reuse across forward calls)
# --------------------------------------------------------------------------- #
def prepare_plr_params(frequencies, weight, bias, *, matmul_dtype=jnp.bfloat16):
    """Build the kernel-ready parameter pack.

    frequencies : (n_features, F)
    weight      : (2F, D)              lite (shared nn.Linear), or
                  (n_features, 2F, D)  non-lite per-feature linear
    bias        : (D,) or (n_features, D)
    """
    n_features, F = frequencies.shape
    lite = weight.ndim == 2
    if lite:
        twoF, D = weight.shape
        assert bias.shape == (D,)
    else:
        assert weight.shape[0] == n_features
        twoF, D = weight.shape[1:]
        assert bias.shape == (n_features, D)
    assert twoF == 2 * F

    # Feature block size:
    #   * FB*D a multiple of 256 -> 256-lane output tiles (full v6e/v7x MXU width,
    #     unmasked vst bursts, FB*D >= 128 so blocks satisfy the lane constraint).
    #   * FB*F a multiple of 128 -> lane-dense sin/cos intermediates, but only when
    #     that does not pad the feature axis beyond what the output requirement
    #     already forces (output writeback dominates for tiny n_features).
    fb_out = max(1, 256 // math.gcd(D, 256))
    fb_dense = max(1, 128 // math.gcd(F, 128))
    FB = min(_lcm(fb_out, fb_dense), _round_up(n_features, fb_out))
    nf_pad = _round_up(n_features, FB)
    n_fb = nf_pad // FB

    f32 = jnp.float32

    # Fold 2*pi*frequencies into the block repeat matrix:
    #   rfreq[j, f, g*F + k] = 2*pi*freq[j*FB + f, k] if g == f else 0
    freq_p = jnp.zeros((nf_pad, F), f32).at[:n_features].set(
        frequencies.astype(f32))
    freq_b = (2.0 * math.pi) * freq_p.reshape(n_fb, FB, F)
    eye = jnp.eye(FB, dtype=f32)
    rfreq = jnp.einsum("jfk,fg->jfgk", freq_b, eye).reshape(n_fb, FB, FB * F)

    if lite:
        # Shared linear: ONE block-diagonal copy, VMEM-resident across the grid.
        w_cos = jnp.broadcast_to(weight[:F].astype(f32)[None], (FB, F, D))
        w_sin = jnp.broadcast_to(weight[F:].astype(f32)[None], (FB, F, D))
        wcat = jnp.concatenate([_block_diag(w_cos), _block_diag(w_sin)],
                               axis=0)[None]                  # (1, 2FB*F, FB*D)
        bias_flat = jnp.broadcast_to(bias.astype(f32)[None],
                                     (FB, D)).reshape(1, 1, FB * D)
    else:
        w_p = jnp.zeros((nf_pad, twoF, D), f32).at[:n_features].set(
            weight.astype(f32))
        b_p = jnp.zeros((nf_pad, D), f32).at[:n_features].set(bias.astype(f32))
        wcos = jax.vmap(_block_diag)(w_p[:, :F].reshape(n_fb, FB, F, D))
        wsin = jax.vmap(_block_diag)(w_p[:, F:].reshape(n_fb, FB, F, D))
        wcat = jnp.concatenate([wcos, wsin], axis=1)          # (n_fb, 2FB*F, FB*D)
        bias_flat = b_p.reshape(n_fb, 1, FB * D)

    wcat = wcat.astype(matmul_dtype)   # cast once in the wrapper, not per step

    return dict(lite=lite, F=F, D=D, FB=FB, n_fb=n_fb,
                n_features=n_features, nf_pad=nf_pad,
                rfreq=rfreq, wcat=wcat, bias_flat=bias_flat)


# --------------------------------------------------------------------------- #
# Forward
# --------------------------------------------------------------------------- #
def plr_embeddings_apply(x, params, *, block_n=1024, out_dtype=None):
    N, nf = x.shape
    assert nf == params["n_features"]
    FB, n_fb, nf_pad = params["FB"], params["n_fb"], params["nf_pad"]
    F, D = params["F"], params["D"]
    out_dtype = x.dtype if out_dtype is None else out_dtype
    f32 = jnp.float32

    # Batch tile: multiple of 8, <= ~block_n, chosen to minimise N padding.
    n_parts = max(1, _cdiv(N, max(block_n, 8)))
    TN = _round_up(_cdiv(N, n_parts), 8)
    N_pad = _round_up(N, TN)
    n_tn = N_pad // TN

    # x laid out per feature block: (n_fb, N_pad, FB). Only the (small) input is
    # transposed; the D-times-larger output needs no transpose at all.
    x_p = jnp.zeros((N_pad, nf_pad), f32).at[:N, :nf].set(x.astype(f32))
    x_r = x_p.reshape(N_pad, n_fb, FB).transpose(1, 0, 2)

    w_index = ((lambda j, i: (0, 0, 0)) if params["wcat"].shape[0] == 1
               else (lambda j, i: (j, 0, 0)))
    b_index = ((lambda j, i: (0, 0, 0)) if params["bias_flat"].shape[0] == 1
               else (lambda j, i: (j, 0, 0)))

    out = pl.pallas_call(
        _plr_kernel,
        out_shape=jax.ShapeDtypeStruct((N_pad, nf_pad * D), out_dtype),
        grid_spec=pltpu.PrefetchScalarGridSpec(
            num_scalar_prefetch=0,
            # Feature blocks OUTER, batch tiles INNER: the weight / bias / rfreq
            # block index is constant across the inner axis, so those tiles are
            # fetched once per feature block, not once per batch tile.
            grid=(n_fb, n_tn),
            in_specs=[
                pl.BlockSpec((1, TN, FB), lambda j, i: (j, i, 0)),
                pl.BlockSpec((1, FB, FB * F), lambda j, i: (j, 0, 0)),
                pl.BlockSpec((1, 2 * FB * F, FB * D), w_index),
                pl.BlockSpec((1, 1, FB * D), b_index),
            ],
            out_specs=pl.BlockSpec((TN, FB * D), lambda j, i: (i, j)),
        ),
        compiler_params=pltpu.CompilerParams(
            # No accumulator / cross-step carry -> both axes parallel (v7x megacore
            # can shard either axis, e.g. the feature axis for small batches).
            dimension_semantics=("parallel", "parallel"),
            vmem_limit_bytes=32 * 1024 * 1024,   # v7x-safe ceiling
        ),
    )(x_r, params["rfreq"], params["wcat"], params["bias_flat"])

    # Free row-major reshape + slice away padding; no output transpose.
    return out.reshape(N_pad, nf_pad, D)[:N, :nf]


def plr_embeddings_pallas(x, frequencies, weight, bias, *, block_n=1024,
                          matmul_dtype=jnp.bfloat16, out_dtype=None):
    """Convenience one-shot entry point.

    For repeated forward passes, call prepare_plr_params() once and reuse the
    result with plr_embeddings_apply() so the block-diagonal weights are not
    rebuilt in HBM on every call.
    """
    params = prepare_plr_params(frequencies, weight, bias,
                                matmul_dtype=matmul_dtype)
    return plr_embeddings_apply(x, params, block_n=block_n, out_dtype=out_dtype)


# --------------------------------------------------------------------------- #
# Init + pure-JAX reference (mirrors the PyTorch module)
# --------------------------------------------------------------------------- #
def init_plr_params(key, n_features, n_frequencies, frequency_scale,
                    d_embedding, lite):
    k_freq, k_w, k_b = jax.random.split(key, 3)
    frequencies = frequency_scale * jax.random.normal(
        k_freq, (n_features, n_frequencies), dtype=jnp.float32)
    fan_in = 2 * n_frequencies
    bound = 1.0 / math.sqrt(fan_in)
    if lite:
        weight = jax.random.uniform(k_w, (fan_in, d_embedding), jnp.float32,
                                    -bound, bound)
        bias = jax.random.uniform(k_b, (d_embedding,), jnp.float32,
                                  -bound, bound)
    else:
        weight = jax.random.uniform(k_w, (n_features, fan_in, d_embedding),
                                    jnp.float32, -bound, bound)
        bias = jax.random.uniform(k_b, (n_features, d_embedding), jnp.float32,
                                  -bound, bound)
    return frequencies, weight, bias


def plr_embeddings_ref(x, frequencies, weight, bias):
    phase = 2.0 * math.pi * frequencies[None] * x[..., None]        # (N, nf, F)
    feats = jnp.concatenate([jnp.cos(phase), jnp.sin(phase)], -1)   # (N, nf, 2F)
    if weight.ndim == 2:                                            # lite
        out = feats @ weight + bias
    else:
        out = jnp.einsum("nfk,fkd->nfd", feats, weight) + bias[None]
    return jax.nn.relu(out)


if __name__ == "__main__":
    key = jax.random.PRNGKey(0)
    k_in, k_in2, k_lite, k_full = jax.random.split(key, 4)
    n_frequencies, frequency_scale, d_embedding = 8, 0.1, 32

    cases = [
        (jax.random.normal(k_in, (8, 4), jnp.float32), 4),
        (jax.random.normal(k_in2, (13, 5), jnp.float32), 5),   # exercises padding
    ]
    ok = True
    for x, n_features in cases:
        N = x.shape[0]
        for lite, k_params in ((True, k_lite), (False, k_full)):
            freqs, weight, bias = init_plr_params(
                k_params, n_features, n_frequencies, frequency_scale,
                d_embedding, lite)
            ref = plr_embeddings_ref(x, freqs, weight, bias)

            # f32 MXU path (tight tolerance).
            out32 = jax.block_until_ready(
                plr_embeddings_pallas(x, freqs, weight, bias,
                                      matmul_dtype=jnp.float32))
            assert out32.shape == (N, n_features, d_embedding)
            ok = ok and bool(jnp.allclose(out32, ref, atol=1e-4, rtol=1e-4))

            # Default bf16-weight MXU fast path (f32 accumulation, looser tol).
            out_bf = jax.block_until_ready(
                plr_embeddings_pallas(x, freqs, weight, bias))
            assert out_bf.shape == (N, n_features, d_embedding)
            ok = ok and bool(jnp.allclose(out_bf, ref, atol=3e-2, rtol=3e-2))

    # Optional bf16 output (halves the dominant output-writeback HBM bytes).
    x, n_features = cases[0]
    freqs, weight, bias = init_plr_params(
        k_lite, n_features, n_frequencies, frequency_scale, d_embedding, True)
    out_b16 = jax.block_until_ready(
        plr_embeddings_pallas(x, freqs, weight, bias, out_dtype=jnp.bfloat16))
    ref = plr_embeddings_ref(x, freqs, weight, bias)
    ok = ok and bool(jnp.allclose(out_b16.astype(jnp.float32), ref,
                                  atol=5e-2, rtol=5e-2))

    if ok:
        print("KERNEL_OK")
</pallas_src>

<mosaic_0001>
module attributes {stable_mosaic.version = 11 : i64} {
  func.func @_plr_kernel(%arg0: i32, %arg1: i32, %arg2: memref<1x8x8xf32, #tpu.memory_space<vmem>>, %arg3: memref<1x8x64xf32, #tpu.memory_space<vmem>>, %arg4: memref<1x128x256xf32, #tpu.memory_space<vmem>>, %arg5: memref<1x1x256xf32, #tpu.memory_space<vmem>>, %arg6: memref<8x256xf32, #tpu.memory_space<vmem>>) attributes {dimension_semantics = [#tpu.dimension_semantics<parallel>, #tpu.dimension_semantics<parallel>], iteration_bounds = array<i64: 1, 1>, scalar_prefetch = 0 : i64, scratch_operands = 0 : i64, tpu.core_type = #tpu.core_type<tc>, window_params = [{transform_indices = @transform_0, window_bounds = array<i64: 1, 8, 8>}, {transform_indices = @transform_1, window_bounds = array<i64: 1, 8, 64>}, {pipeline_mode = #tpu.pipeline_mode<synchronous>, transform_indices = @transform_2, window_bounds = array<i64: 1, 128, 256>}, {pipeline_mode = #tpu.pipeline_mode<synchronous>, transform_indices = @transform_3, window_bounds = array<i64: 1, 1, 256>}, {transform_indices = @transform_4, window_bounds = array<i64: 8, 256>}]} {
    %c0 = arith.constant 0 : index
    %c0_0 = arith.constant 0 : index
    %c0_1 = arith.constant 0 : index
    %0 = vector.load %arg2[%c0, %c0_0, %c0_1] : memref<1x8x8xf32, #tpu.memory_space<vmem>>, vector<1x8x8xf32>
    %1 = vector.shape_cast %0 : vector<1x8x8xf32> to vector<8x8xf32>
    %c0_2 = arith.constant 0 : index
    %c0_3 = arith.constant 0 : index
    %c0_4 = arith.constant 0 : index
    %2 = vector.load %arg3[%c0_2, %c0_3, %c0_4] : memref<1x8x64xf32, #tpu.memory_space<vmem>>, vector<1x8x64xf32>
    %3 = vector.shape_cast %2 : vector<1x8x64xf32> to vector<8x64xf32>
    %cst = arith.constant dense<0.000000e+00> : vector<8x64xf32>
    %4 = tpu.matmul %1, %3, %cst {dimension_numbers = #tpu.dot_dimension_numbers<[1], [0], [0], [1], [0, 0, 1, 1], [], []>} : vector<8x8xf32>, vector<8x64xf32>, vector<8x64xf32> -> vector<8x64xf32>
    %5 = math.cos %4 : vector<8x64xf32>
    %6 = math.sin %4 : vector<8x64xf32>
    %7 = tpu.concatenate %5, %6 in 1 : vector<8x64xf32>, vector<8x64xf32> -> vector<8x128xf32>
    %c0_5 = arith.constant 0 : index
    %c0_6 = arith.constant 0 : index
    %c0_7 = arith.constant 0 : index
    %8 = vector.load %arg4[%c0_5, %c0_6, %c0_7] : memref<1x128x256xf32, #tpu.memory_space<vmem>>, vector<1x128x256xf32>
    %9 = vector.shape_cast %8 : vector<1x128x256xf32> to vector<128x256xf32>
    %cst_8 = arith.constant dense<0.000000e+00> : vector<8x256xf32>
    %10 = tpu.matmul %7, %9, %cst_8 {dimension_numbers = #tpu.dot_dimension_numbers<[1], [0], [0], [1], [0, 0, 1, 1], [], []>} : vector<8x128xf32>, vector<128x256xf32>, vector<8x256xf32> -> vector<8x256xf32>
    %c0_9 = arith.constant 0 : index
    %c0_10 = arith.constant 0 : index
    %c0_11 = arith.constant 0 : index
    %11 = vector.load %arg5[%c0_9, %c0_10, %c0_11] : memref<1x1x256xf32, #tpu.memory_space<vmem>>, vector<1x1x256xf32>
    %12 = vector.shape_cast %11 : vector<1x1x256xf32> to vector<1x256xf32>
    %13 = vector.broadcast %12 : vector<1x256xf32> to vector<8x256xf32>
    %14 = arith.addf %10, %13 : vector<8x256xf32>
    %cst_12 = arith.constant 0.000000e+00 : f32
    %15 = vector.broadcast %cst_12 : f32 to vector<8x256xf32>
    %16 = arith.maximumf %14, %15 : vector<8x256xf32>
    %c0_13 = arith.constant 0 : index
    %c0_14 = arith.constant 0 : index
    %17 = vector.load %arg6[%c0_13, %c0_14] : memref<8x256xf32, #tpu.memory_space<vmem>>, vector<8x256xf32>
    tpu.vector_store %arg6[%c0_13, %c0_14], %16 {strides = array<i32>} : memref<8x256xf32, #tpu.memory_space<vmem>>, vector<8x256xf32>,
    return
  }
  func.func @transform_0(%arg0: i32, %arg1: i32) -> (i32, i32, i32) {
    %c0_i32 = arith.constant 0 : i32
    %c0_i32_0 = arith.constant 0 : i32
    return %arg0, %arg1, %c0_i32 : i32, i32, i32
  }
  func.func @transform_1(%arg0: i32, %arg1: i32) -> (i32, i32, i32) {
    %c0_i32 = arith.constant 0 : i32
    %c0_i32_0 = arith.constant 0 : i32
    %c0_i32_1 = arith.constant 0 : i32
    return %arg0, %c0_i32, %c0_i32_0 : i32, i32, i32
  }
  func.func @transform_2(%arg0: i32, %arg1: i32) -> (i32, i32, i32) {
    %c0_i32 = arith.constant 0 : i32
    %c0_i32_0 = arith.constant 0 : i32
    %c0_i32_1 = arith.constant 0 : i32
    %c0_i32_2 = arith.constant 0 : i32
    return %c0_i32, %c0_i32_0, %c0_i32_1 : i32, i32, i32
  }
  func.func @transform_3(%arg0: i32, %arg1: i32) -> (i32, i32, i32) {
    %c0_i32 = arith.constant 0 : i32
    %c0_i32_0 = arith.constant 0 : i32
    %c0_i32_1 = arith.constant 0 : i32
    %c0_i32_2 = arith.constant 0 : i32
    return %c0_i32, %c0_i32_0, %c0_i32_1 : i32, i32, i32
  }
  func.func @transform_4(%arg0: i32, %arg1: i32) -> (i32, i32) {
    %c0_i32 = arith.constant 0 : i32
    return %arg1, %arg0 : i32, i32
  }
}

</mosaic_0001>

<bundles_post_ra>
// kernel: tpu_custom_call.1
= control target key start
LH: loop header
LB: loop body
LE: loop exit
PB: predicated region body
PF: predicated region fallthrough
CT: control target
= control target key end

     0   :  { %9 = vsyncpa [#allocation3], 0  ;;  %s756_s0 = inlined_call_operand.hbm [shape: f32[1,8,8], index: 0, kind: input, shape index: {}]   ;;  %s757_s1 = inlined_call_operand.hbm [shape: f32[1,8,64], index: 1, kind: input, shape index: {}]   ;;  %s758_s2 = inlined_call_operand.hbm [shape: f32[1,128,256], index: 2, kind: input, shape index: {}]   ;;  %s759_s3 = inlined_call_operand.vmem [shape: f32[1,1,256], index: 3, kind: input, shape index: {}]   ;;  %s760_s4 = inlined_call_operand.hbm [shape: f32[8,256], index: 4, kind: output, shape index: {}]  }
   0x1   :  { %10 = vsyncpa [#allocation6], 0 }
   0x2   :  { %11 = vsyncpa [#allocation4], 0  ;;  %s644_s15 = smov [#allocation5]   ;;  %s645_s17 = smov [#allocation2]  }
   0x3   :  { %s28_s16 = sshll.u32 %s644_s15, 4  ;;  %s18_s18 = sshll.u32 %s645_s17, 4  ;;  %s29_s16 = int_to_ptr.vmem [resolvable:$true] %s28_s16  ;;  %s19_s18 = int_to_ptr.vmem [resolvable:$true] %s18_s18 }
   0x4   :  { %s550_s21 = scalar_lea.hbm %s757_s1, 128 }
   0x5   :  { %p551_p0 = scmp.ne.s32.totalorder %s757_s1, %s550_s21  ;;  %p554_p1 = scmp.lt.u32.totalorder %s550_s21, %s757_s1 }
   0x7   :  { %p556_p2 = pnand %p554_p1, %p551_p0 }
   0x9   :  { %559 = shalt.err (!%p556_p2)
}
   0xa   :  { %s560_s26 = scalar_lea.vmem %s29_s16, 128  ;;  %p565_p4 = scmp.lt.s32.totalorder %s29_s16, %s29_s16 }
   0xb   :  { %p561_p3 = scmp.ne.s32.totalorder %s29_s16, %s560_s26  ;;  %p566_p5 = scmp.lt.s32.totalorder %s560_s26, %s560_s26 }
   0xd   :  { %p567_p6 = por %p566_p5, %p565_p4 }
   0xf   :  { %p568_p7 = pnand %p567_p6, %p561_p3 }
  0x11   :  { %571 = shalt.err (!%p568_p7)
}
  0x12   :  { %31 = dma.hbm_to_vmem [thread:$0]  %s757_s1, 128, %s29_s16, [#allocation6]  }
  0x13   :  { %s572_s5 = scalar_lea.hbm %s756_s0, 128 }
  0x14   :  { %p573_p8 = scmp.ne.s32.totalorder %s756_s0, %s572_s5  ;;  %p576_p9 = scmp.lt.u32.totalorder %s572_s5, %s756_s0 }
  0x16   :  { %p578_p10 = pnand %p576_p9, %p573_p8 }
  0x18   :  { %581 = shalt.err (!%p578_p10)
}
  0x19   :  { %s582_s10 = scalar_lea.vmem %s19_s18, 128  ;;  %p587_p12 = scmp.lt.s32.totalorder %s19_s18, %s19_s18 }
  0x1a   :  { %p583_p11 = scmp.ne.s32.totalorder %s19_s18, %s582_s10  ;;  %p588_p13 = scmp.lt.s32.totalorder %s582_s10, %s582_s10 }
  0x1c   :  { %p589_p0 = por %p588_p13, %p587_p12 }
  0x1e   :  { %p590_p1 = pnand %p589_p0, %p583_p11 }
  0x20   :  { %593 = shalt.err (!%p590_p1)
}
  0x21   :  { %21 = dma.hbm_to_vmem [thread:$0]  %s756_s0, 128, %s19_s18, [#allocation3]  }
  0x22   :  { %s646_s12 = smov [#allocation7]   ;;  %s594_s16 = scalar_lea.hbm %s758_s2, 4096 }
  0x23   :  { %s37_s13 = sshll.u32 %s646_s12, 4  ;;  %p595_p2 = scmp.ne.s32.totalorder %s758_s2, %s594_s16  ;;  %s38_s13 = int_to_ptr.vmem [resolvable:$true] %s37_s13 }
  0x24   :  { %p598_p3 = scmp.lt.u32.totalorder %s594_s16, %s758_s2 }
  0x26   :  { %p600_p4 = pnand %p598_p3, %p595_p2 }
  0x28   :  { %603 = shalt.err (!%p600_p4)
}
  0x29   :  { %s604_s22 = scalar_lea.vmem %s38_s13, 4096  ;;  %p609_p6 = scmp.lt.s32.totalorder %s38_s13, %s38_s13 }
  0x2a   :  { %p605_p5 = scmp.ne.s32.totalorder %s38_s13, %s604_s22  ;;  %p610_p7 = scmp.lt.s32.totalorder %s604_s22, %s604_s22 }
  0x2c   :  { %p611_p8 = por %p610_p7, %p609_p6 }
  0x2e   :  { %p612_p9 = pnand %p611_p8, %p605_p5 }
  0x30   :  { %615 = shalt.err (!%p612_p9)
}
  0x31   :  { %s647_s0 = smov 256   ;;  %s648_s18 = smov 16  }
  0x32   :  { %43 = dma.hbm_to_vmem [thread:$0]  %s758_s2, 4096, %s38_s13, [#allocation6], %s647_s0, %s647_s0, %s648_s18  }
  0x33   :  { %638 = dma.done.wait [#allocation3], 128  }
  0x34   :  { %639 = vsyncadd [#allocation3], 4294967168 }
  0x35   :  { %640 = dma.done.wait [#allocation6], 4224  }
  0x36   :  { %641 = vsyncadd [#allocation6], 4294963072  ;;  %v649_v0 = vmov 0.0   ;;  %vm650_vm0 = vmmov 0   ;;  %vm57_vm1 = vcmask 64512   ;;  %v56_v1 = vld [vmem:[#allocation5] sm:$0xff] }
  0x37   :  { %490 = vmatprep.subr.mxu0 %v649_v0  ;;  %492 = vmatprep.mubr.msk.f32.mxu0 %vm650_vm0, %v649_v0  ;;  %v55_v2 = vld [vmem:[#allocation2] sm:$0xff]  ;;  %v345_v3 = vld [vmem:[#allocation7 + $0x8] sm:$0xff]  ;;  %v347_v4 = vld [vmem:[#allocation7 + $0x18] sm:$0xff]  ;;  %v651_v63 = vmov 683565275   ;;  %s657_s2 = smov 64  }
  0x38   :  { %452 = vmatprep.mubr.f32.mxu1 %v649_v0  ;;  %491 = vmatpush3.msra.mxu0 %v56_v1  ;;  %v344_v5 = vld [vmem:[#allocation7] sm:$0xff]  ;;  %v495_v6 = vpack.c.bf16 %v347_v4, %v345_v3  ;;  %v346_v7 = vld [vmem:[#allocation7 + $0x10] sm:$0xff]  ;;  %v349_v8 = vld [vmem:[#allocation7 + $0x28] sm:$0xff]  ;;  %v652_v1 = vmov 2475754826   ;;  %s658_s27 = smov [#allocation8]  }
  0x39   :  { %493 = vmatmul.mubr.msk.f32.vlgmr.msra.gmra.mrb[0].mxu0 %vm57_vm1, %v55_v2  ;;  %v351_v9 = vld [vmem:[#allocation7 + $0x38] sm:$0xff]  ;;  %v497_v10 = vpack.c.bf16 %v346_v7, %v344_v5  ;;  %v348_v12 = vld [vmem:[#allocation7 + $0x20] sm:$0xff]  ;;  %v350_v13 = vld [vmem:[#allocation7 + $0x30] sm:$0xff]  ;;  %v653_v4 = vmov 2131351028   ;;  %s469_s28 = sshll.u32 %s658_s27, 4  ;;  %s470_s28 = int_to_ptr.vmem [resolvable:$true] %s469_s28 }
  0x3a   :  { %v499_v11 = vpack.c.bf16 %v351_v9, %v349_v8  ;;  %v353_v14 = vld [vmem:[#allocation7 + $0x48] sm:$0xff]  ;;  %496 = vmatprep.subr.bf16.mxu1 %v495_v6  ;;  %v355_v15 = vld [vmem:[#allocation7 + $0x58] sm:$0xff]  ;;  %v501_v16 = vpack.c.bf16 %v350_v13, %v348_v12  ;;  %v352_v18 = vld [vmem:[#allocation7 + $0x40] sm:$0xff]  ;;  %v654_v7 = vmov 2102212464   ;;  %s616_s29 = scalar_lea.vmem %s470_s28, 256  ;;  %p621_p11 = scmp.lt.s32.totalorder %s470_s28, %s470_s28 }
  0x3b   :  { %498 = vmatpush1.bf16.msra.mxu1 %v497_v10  ;;  %v503_v17 = vpack.c.bf16 %v355_v15, %v353_v14  ;;  %v354_v19 = vld [vmem:[#allocation7 + $0x50] sm:$0xff]  ;;  %v357_v20 = vld [vmem:[#allocation7 + $0x68] sm:$0xff]  ;;  %v359_v21 = vld [vmem:[#allocation7 + $0x78] sm:$0xff]  ;;  %v655_v10 = vmov 920167782   ;;  %p617_p10 = scmp.ne.s32.totalorder %s470_s28, %s616_s29  ;;  %p622_p12 = scmp.lt.s32.totalorder %s616_s29, %s616_s29 }
  0x3c   :  { %500 = vmatprep.subr.bf16.mxu1 %v499_v11  ;;  %v505_v22 = vpack.c.bf16 %v354_v19, %v352_v18  ;;  %v507_v23 = vpack.c.bf16 %v359_v21, %v357_v20  ;;  %v356_v24 = vld [vmem:[#allocation7 + $0x60] sm:$0xff]  ;;  %v358_v25 = vld [vmem:[#allocation7 + $0x70] sm:$0xff]  ;;  %v361_v26 = vld [vmem:[#allocation7 + $0x88] sm:$0xff]  ;;  %v656_v13 = vmov 1326507024  }
  0x3d   :  { %v363_v27 = vld [vmem:[#allocation7 + $0x98] sm:$0xff]  ;;  %v509_v28 = vpack.c.bf16 %v358_v25, %v356_v24  ;;  %v360_v30 = vld [vmem:[#allocation7 + $0x80] sm:$0xff]  ;;  %v362_v31 = vld [vmem:[#allocation7 + $0x90] sm:$0xff]  ;;  %p623_p13 = por %p622_p12, %p621_p11 }
  0x3e   :  { %v511_v29 = vpack.c.bf16 %v363_v27, %v361_v26  ;;  %v365_v32 = vld [vmem:[#allocation7 + $0xa8] sm:$0xff]  ;;  %v367_v33 = vld [vmem:[#allocation7 + $0xb8] sm:$0xff]  ;;  %v513_v34 = vpack.c.bf16 %v362_v31, %v360_v30  ;;  %v364_v36 = vld [vmem:[#allocation7 + $0xa0] sm:$0xff] }
  0x3f   :  { %502 = vmatpush1.bf16.msra.mxu1 %v501_v16  ;;  %v515_v35 = vpack.c.bf16 %v367_v33, %v365_v32  ;;  %v366_v37 = vld [vmem:[#allocation7 + $0xb0] sm:$0xff]  ;;  %v369_v38 = vld [vmem:[#allocation7 + $0xc8] sm:$0xff]  ;;  %v371_v39 = vld [vmem:[#allocation7 + $0xd8] sm:$0xff]  ;;  %p624_p0 = pnand %p623_p13, %p617_p10 }
  0x40   :  { %504 = vmatprep.subr.bf16.mxu1 %v503_v17  ;;  %v517_v40 = vpack.c.bf16 %v366_v37, %v364_v36  ;;  %v519_v41 = vpack.c.bf16 %v371_v39, %v369_v38  ;;  %v368_v42 = vld [vmem:[#allocation7 + $0xc0] sm:$0xff]  ;;  %v370_v43 = vld [vmem:[#allocation7 + $0xd0] sm:$0xff]  ;;  %v373_v44 = vld [vmem:[#allocation7 + $0xe8] sm:$0xff] }
  0x41   :  { %v375_v45 = vld [vmem:[#allocation7 + $0xf8] sm:$0xff]  ;;  %v521_v46 = vpack.c.bf16 %v370_v43, %v368_v42  ;;  %v372_v48 = vld [vmem:[#allocation7 + $0xe0] sm:$0xff]  ;;  %v374_v49 = vld [vmem:[#allocation7 + $0xf0] sm:$0xff] }
  0x42   :  { %v523_v47 = vpack.c.bf16 %v375_v45, %v373_v44  ;;  %v525_v50 = vpack.c.bf16 %v374_v49, %v372_v48 }
  0x43   :  { %506 = vmatpush1.bf16.msra.mxu1 %v505_v22 }
  0x44   :  { %508 = vmatprep.subr.bf16.mxu1 %v507_v23 }
  0x47   :  { %510 = vmatpush1.bf16.msra.mxu1 %v509_v28 }
  0x48   :  { %512 = vmatprep.subr.bf16.mxu1 %v511_v29 }
  0x4b   :  { %514 = vmatpush1.bf16.msra.mxu1 %v513_v34 }
  0x4c   :  { %516 = vmatprep.subr.bf16.mxu1 %v515_v35 }
  0x4f   :  { %518 = vmatpush1.bf16.msra.mxu1 %v517_v40 }
  0x50   :  { %520 = vmatprep.subr.bf16.mxu1 %v519_v41 }
  0x53   :  { %522 = vmatpush1.bf16.msra.mxu1 %v521_v46 }
  0x54   :  { %524 = vmatprep.subr.bf16.mxu1 %v523_v47 }
  0x57   :  { %526 = vmatpush1.bf16.msra.mxu1 %v525_v50 }
 0x10c   :  { %v720_v51 = vpop.f32.mrb[0].mxu0 }
 0x10d   :  { %v134_v52 = vand.u32 2139095040, %v720_v51  ;;  %v494_v53 = vpop.f32.mrb[1].mxu0  ;;  %v131_v57 = vand.u32 2147483647, %v720_v51  ;;  %vm133_vm9 = vcmp.lt.s32.totalorder %v720_v51, 0  ;;  %vm223_vm1 = vweird.f32 %v720_v51 }
 0x10f   :  { %v135_v54 = vshrl.u32 %v134_v52, 23  ;;  %v138_v60 = vand.u32 8388607, %v131_v57  ;;  %vm132_vm10 = vcmp.le.f32.partialorder %v131_v57, 0.7853982 }
 0x111   :  { %v480_v55 = vadd.s32 4294967169, %v135_v54  ;;  %v139_v15 = vor.u32 8388608, %v138_v60 }
 0x113   :  { %v141_v56 = vadd.s32 1, %v480_v55  ;;  %v179_v29 = vshll.u32 %v139_v15, 8 }
 0x115   :  { %vm142_vm2 = vcmp.gt.s32.totalorder %v141_v56, 0 }
 0x116   :  { %v143_v58 = vsel %vm142_vm2, %v141_v56, 0  ;;  %vm342_vm2 = vcmask 523264  }
 0x117   :  { %v145_v59 = vand.u32 31, %v143_v58  ;;  %v144_v62 = vshrl.u32 %v143_v58, 5 }
 0x119   :  { %v146_v61 = vsub.s32 32, %v145_v59  ;;  %v148_v0 = vshll.u32 %v651_v63, %v145_v59  ;;  %v151_v2 = vshll.u32 %v652_v1, %v145_v59  ;;  %v154_v6 = vshll.u32 %v653_v4, %v145_v59 }
 0x11a   :  { %v157_v9 = vshll.u32 %v654_v7, %v145_v59  ;;  %v160_v12 = vshll.u32 %v655_v10, %v145_v59  ;;  %vm163_vm3 = vcmp.lt.s32.totalorder %v144_v62, 1  ;;  %vm166_vm4 = vcmp.lt.s32.totalorder %v144_v62, 4 }
 0x11b   :  { %v149_v3 = vshrl.u32 %v652_v1, %v146_v61  ;;  %v152_v5 = vshrl.u32 %v653_v4, %v146_v61  ;;  %v155_v8 = vshrl.u32 %v654_v7, %v146_v61  ;;  %v158_v11 = vshrl.u32 %v655_v10, %v146_v61 }
 0x11c   :  { %v161_v14 = vshrl.u32 %v656_v13, %v146_v61  ;;  %v147_v24 = vshrl.u32 %v651_v63, %v146_v61  ;;  %vm165_vm5 = vcmp.lt.s32.totalorder %v144_v62, 3  ;;  %vm164_vm6 = vcmp.lt.s32.totalorder %v144_v62, 2 }
 0x11d   :  { %v150_v16 = vor.u32 %v149_v3, %v148_v0  ;;  %v153_v17 = vor.u32 %v152_v5, %v151_v2  ;;  %v156_v18 = vor.u32 %v155_v8, %v154_v6  ;;  %v159_v19 = vor.u32 %v158_v11, %v157_v9 }
 0x11e   :  { %v162_v20 = vor.u32 %v161_v14, %v160_v12 }
 0x11f   :  { %v168_v21 = vsel %vm166_vm4, %v156_v18, 2102212464  ;;  %v171_v22 = vsel %vm163_vm3, %v150_v16, %v153_v17  ;;  %v175_v23 = vsel %vm163_vm3, %v153_v17, %v156_v18  ;;  %v172_v25 = vsel %vm166_vm4, %v159_v19, 920167782 }
 0x120   :  { %v176_v26 = vsel %vm166_vm4, %v162_v20, 1326507024  ;;  %v173_v27 = vsel %vm165_vm5, %v156_v18, %v172_v25  ;;  %v167_v30 = vsel %vm163_vm3, %v147_v24, %v150_v16  ;;  %v169_v31 = vsel %vm165_vm5, %v153_v17, %v168_v21 }
 0x121   :  { %v177_v28 = vsel %vm165_vm5, %v159_v19, %v176_v26  ;;  %v174_v32 = vsel %vm164_vm6, %v171_v22, %v173_v27  ;;  %v170_v38 = vsel %vm164_vm6, %v167_v30, %v169_v31  ;;  %v378_v24 = vlaneseq  ;;  %v376_v27 = vld [vmem:[%s759_s3] sm:$0x3] }
 0x122   :  { %v178_v33 = vsel %vm164_vm6, %v175_v23, %v177_v28  ;;  %v729_v36 = vmul.u32.u64.low %v179_v29, %v174_v32  ;;  %v730_v37 = vmul.u32.u64.high %v179_v29, %v174_v32, %v729_v36  ;;  %v186_v40 = vmul.u32 %v179_v29, %v170_v38 }
 0x123   :  { %v726_v34 = vmul.u32.u64.low %v179_v29, %v178_v33  ;;  %v727_v35 = vmul.u32.u64.high %v179_v29, %v178_v33, %v726_v34  ;;  %v379_v25 = vshrl.u32 %v378_v24, 7 }
 0x124   :  { %v189_v39 = vadd.s32 1, %v730_v37 }
 0x125   :  { %vm188_vm7 = vc.u32 %v727_v35, %v729_v36  ;;  %v187_v53 = vadd.s32 %v729_v36, %v727_v35  ;;  %v380_v26 = vsub.s32 0, %v379_v25  ;;  %v384_v28 = vsub.s32 1, %v379_v25 }
 0x126   :  { %v190_v41 = vsel %vm188_vm7, %v189_v39, %v730_v37 }
 0x127   :  { %v191_v42 = vadd.s32 %v190_v41, %v186_v40  ;;  %v381_v29 = vrot.slane %v376_v27, %v380_v26 }
 0x129   :  { %v192_v43 = vadd.s32 536870912, %v191_v42 }
 0x12b   :  { %v193_v44 = vshrl.u32 %v192_v43, 30 }
 0x12d   :  { %v194_v45 = vshll.u32 %v193_v44, 30  ;;  %v217_v2 = vsub.s32 4, %v193_v44 }
 0x12f   :  { %v195_v46 = vsub.s32 %v191_v42, %v194_v45  ;;  %v218_v5 = vsel %vm133_vm9, %v217_v2, %v193_v44 }
 0x130   :  { %v220_v7 = vsel %vm132_vm10, 0, %v218_v5 }
 0x131   :  { %v197_v47 = vsub.s32 0, %v195_v46  ;;  %v327_v8 = vadd.s32 3, %v220_v7  ;;  %v224_v9 = vand.u32 3, %v220_v7 }
 0x133   :  { %v481_v48 = vmin.u32 %v197_v47, %v195_v46  ;;  %v328_v10 = vand.u32 3, %v327_v8  ;;  %vm229_vm11 = vcmp.eq.s32.totalorder %v224_v9, 2  ;;  %vm226_vm13 = vcmp.eq.s32.totalorder %v224_v9, 0 }
 0x134   :  { %vm225_vm15 = vcmp.lt.s32.totalorder %v224_v9, 2 }
 0x135   :  { %v199_v49 = vclz %v481_v48  ;;  %vm333_vm12 = vcmp.eq.s32.totalorder %v328_v10, 2  ;;  %vm330_vm14 = vcmp.eq.s32.totalorder %v328_v10, 0  ;;  %vm329_vm0 = vcmp.lt.s32.totalorder %v328_v10, 2 }
 0x137   :  { %v482_v50 = vadd.s32 4294967294, %v199_v49 }
 0x139   :  { %vm483_vm8 = vcmp.lt.s32.totalorder %v482_v50, 0 }
 0x13a   :  { %v202_v52 = vsel %vm483_vm8, 0, %v482_v50 }
 0x13b   :  { %v203_v54 = vsub.s32 32, %v202_v52  ;;  %v207_v55 = vsub.s32 4294967266, %v202_v52  ;;  %v204_v56 = vshll.u32 %v195_v46, %v202_v52 }
 0x13d   :  { %v205_v58 = vshrl.u32 %v187_v53, %v203_v54  ;;  %v208_v59 = vadd.s32 127, %v207_v55 }
 0x13f   :  { %v206_v60 = vor.u32 %v205_v58, %v204_v56  ;;  %v209_v61 = vshll.u32 %v208_v59, 23 }
 0x141   :  { %v210_v62 = vor.u32 4788187, %v209_v61  ;;  %v213_v0 = vcvt.s32.f32 %v206_v60 }
 0x143   :  { %v211_v63 = vand.u32 2147483647, %v210_v62 }
 0x145   :  { %v214_v1 = vmul.f32 %v213_v0, %v211_v63 }
 0x147   :  { %v215_v3 = vxor.u32 2147483648, %v214_v1 }
 0x149   :  { %v216_v4 = vsel %vm133_vm9, %v215_v3, %v214_v1 }
 0x14a   :  { %v219_v6 = vsel %vm132_vm10, %v720_v51, %v216_v4  ;;  %v385_v51 = vrot.slane %v376_v27, %v384_v28 }
 0x14b   :  { %546 = vcosq.f32 %v219_v6 }
 0x14c   :  { %548 = vsinq.f32 %v219_v6 }
 0x155   :  { %v547_v11 = vpop.eup %546 }
 0x156   :  { %v549_v12 = vpop.eup %548  ;;  %v230_v13 = vxor.u32 2147483648, %v547_v11 }
 0x157   :  { %v227_v14 = vxor.u32 2147483648, %v549_v12 }
 0x158   :  { %v231_v15 = vsel %vm229_vm11, %v230_v13, %v549_v12  ;;  %v335_v57 = vsel %vm333_vm12, %v230_v13, %v549_v12 }
 0x159   :  { %v228_v16 = vsel %vm226_vm13, %v547_v11, %v227_v14  ;;  %v332_v17 = vsel %vm330_vm14, %v547_v11, %v227_v14 }
 0x15a   :  { %v232_v18 = vsel %vm225_vm15, %v228_v16, %v231_v15  ;;  %v336_v19 = vsel %vm329_vm0, %v332_v17, %v335_v57 }
 0x15b   :  { %v233_v20 = vsel %vm223_vm1, nan, %v232_v18  ;;  %v337_v21 = vsel %vm223_vm1, nan, %v336_v19 }
 0x15c   :  { %339 = vrot.lane.b32.xlu0 %v337_v21, %s657_s2 }
 0x1ce   :  { %v340_v22 = vpop.permute.xlu0 %339 }
 0x1cf   :  { %v343_v23 = vsel %vm342_vm2, %v233_v20, %v340_v22 }
 0x1d0   :  { %453 = vmatmul.mubr.f32.vlgmr.msra.gmra.mrb[0].mxu1 %v343_v23 }
 0x2a3   :  { %v454_v30 = vpop.f32.mrb[0].mxu1 }
 0x2a4   :  { %v455_v31 = vadd.f32 %v454_v30, %v381_v29  ;;  %v456_v32 = vpop.f32.mrb[1].mxu1 }
 0x2a5   :  { %v457_v33 = vadd.f32 %v456_v32, %v385_v51 }
 0x2a6   :  { %v459_v34 = vmax.f32 %v455_v31, 0.0 }
 0x2a7   :  { %v460_v35 = vmax.f32 %v457_v33, 0.0 }
 0x2a8   :  { %461 = vst [vmem:[#allocation8] sm:$0xff] %v459_v34 }
 0x2a9   :  { %462 = vst [vmem:[#allocation8 + $0x8] sm:$0xff] %v460_v35 }
 0x2aa   :  { %627 = shalt.err (!%p624_p0)
}
 0x2ab   :  { %s628_s5 = scalar_lea.hbm %s760_s4, 256 }
 0x2ac   :  { %p629_p1 = scmp.ne.s32.totalorder %s760_s4, %s628_s5  ;;  %p632_p2 = scmp.lt.u32.totalorder %s628_s5, %s760_s4 }
 0x2ae   :  { %p634_p3 = pnand %p632_p2, %p629_p1 }
 0x2b0   :  { %637 = shalt.err (!%p634_p3)
}
 0x2b1   :  { %472 = dma.vmem_to_hbm [thread:$0]  %s470_s28, 256, %s760_s4, [#allocation4]  }
 0x2b2   :  { %642 = dma.done.wait [#allocation4], 256  }
 0x2b3   :  { %643 = vsyncadd [#allocation4], 4294967040 }
 0x2b4   :  { %476 = vsyncpa [#allocation3], 1 }
 0x2b5   :  { %477 = vsyncpa [#allocation6], 1 }
 0x2b6   :  { %478 = vsyncpa [#allocation4], 1 }

</bundles_post_ra>
